<compile_context>
chip_gen: v7x
topology: tpu7x:2x2x1
jax: 0.10.0
libtpu: 0.0.40
codegen_flags: <defaults>
</compile_context>

<pallas_src>
import jax
import jax.numpy as jnp
from jax.experimental import pallas as pl
from jax.experimental.pallas import tpu as pltpu


# ----------------------------------------------------------------------------
# Tiling helpers
# ----------------------------------------------------------------------------
def _round_up(n, m):
    return ((n + m - 1) // m) * m


def _pick_b_tile(B):
    for t in (256, 128, 64, 32, 16, 8):
        if B % t == 0:
            return t
    return B


def _pick_hw_chunk(HW, tile_b, C, itemsize, per_buffer_budget=6 << 20):
    """Prefer ~512-lane chunks (>=85% of HBM roofline); larger only if they fit
    the per-buffer VMEM budget; fall back to the full extent otherwise."""
    for c in (512, 1024, 2048, 256, 128):
        if HW % c == 0 and tile_b * C * c * itemsize <= per_buffer_budget:
            return c
    return HW


def _vmem_limit_bytes(tile_b, C, chunk, x_item, wcols, out_cols):
    # Rough (8,128)-padded, double-buffered working-set estimate.
    x_tile = tile_b * max(C, 8) * chunk * x_item
    w_tile = max(C, 8) * wcols * 4
    b_tile = 8 * wcols * 4
    o_tile = max(tile_b, 8) * out_cols * 4
    acc = max(tile_b, 8) * max(C, 128) * 4
    est = 2 * (x_tile + w_tile + b_tile + o_tile) + acc
    return int(min(max(2 * est, 4 << 20), 32 << 20))


# ----------------------------------------------------------------------------
# Fused kernel: tiled GAP (accumulate) -> classifier matmul (+optional select)
# ----------------------------------------------------------------------------
def _make_fused_kernel(inv_hw, finalize):
    def kernel(x_ref, w_ref, b_ref, o_ref, acc_ref):
        hi = pl.program_id(1)

        @pl.when(hi == 0)
        def _init():
            acc_ref[...] = jnp.zeros_like(acc_ref)

        # Partial spatial sum of this HW chunk, accumulated in f32.
        acc_ref[...] += jnp.sum(x_ref[...].astype(jnp.float32), axis=-1)

        @pl.when(hi == pl.num_programs(1) - 1)
        def _fin():
            feats = acc_ref[...] * inv_hw                     # (tile_b, C) f32
            wv = w_ref[...]
            fv = feats if wv.dtype == jnp.float32 else feats.astype(wv.dtype)
            y = (jnp.dot(fv, wv, preferred_element_type=jnp.float32)
                 + b_ref[...].astype(jnp.float32))            # (tile_b, wcols)
            z = y if finalize is None else finalize(y)        # (tile_b, out_cols)
            o_ref[...] = z.astype(o_ref.dtype)

    return kernel


def _fused_gap_linear(x3, w_slab, b_slab, out_cols, finalize=None):
    """x3: (B, C, HW) native dtype; w_slab: (C, wcols); b_slab: (1, wcols).
    Returns (B, out_cols) f32."""
    B, C, HW = x3.shape
    wcols = w_slab.shape[1]
    x_item = jnp.dtype(x3.dtype).itemsize

    tile_b = _pick_b_tile(B)
    chunk = _pick_hw_chunk(HW, tile_b, C, x_item)
    grid = (B // tile_b, HW // chunk)

    cost = pl.CostEstimate(
        flops=B * C * HW + 2 * B * C * wcols,
        transcendentals=0,
        bytes_accessed=int(B * C * HW * x_item + C * wcols * 4
                           + wcols * 4 + B * out_cols * 4))

    kernel = _make_fused_kernel(1.0 / HW, finalize)

    return pl.pallas_call(
        kernel,
        out_shape=jax.ShapeDtypeStruct((B, out_cols), jnp.float32),
        grid_spec=pltpu.PrefetchScalarGridSpec(
            num_scalar_prefetch=0,
            grid=grid,
            in_specs=[
                pl.BlockSpec((tile_b, C, chunk), lambda bi, hi: (bi, 0, hi)),
                pl.BlockSpec((C, wcols), lambda bi, hi: (0, 0)),
                pl.BlockSpec((1, wcols), lambda bi, hi: (0, 0)),
            ],
            out_specs=pl.BlockSpec((tile_b, out_cols), lambda bi, hi: (bi, 0)),
            scratch_shapes=[pltpu.VMEM((tile_b, C), jnp.float32)],
        ),
        compiler_params=pltpu.CompilerParams(
            dimension_semantics=("parallel", "arbitrary"),
            vmem_limit_bytes=_vmem_limit_bytes(tile_b, C, chunk, x_item,
                                               wcols, out_cols)),
        cost_estimate=cost,
    )(x3, w_slab, b_slab)


# ----------------------------------------------------------------------------
# One-time parameter preparation (hoisted out of the per-call path)
# ----------------------------------------------------------------------------
def prepare_concat_params(net_w, net_b, *, cpg, meaning_neurons):
    G, C, N = net_w.shape
    if meaning_neurons == "inplace":
        cols = [net_w[g, :, g * cpg:(g + 1) * cpg] for g in range(G)]
        bs = [net_b[g, g * cpg:(g + 1) * cpg] for g in range(G)]
    elif meaning_neurons == "first":
        cols = [net_w[g, :, :cpg] for g in range(G)]
        bs = [net_b[g, :cpg] for g in range(G)]
    else:
        raise Exception("unknown dycs_meaning_neurons")
    nout = G * cpg
    npad = _round_up(nout, 128)
    w = jnp.pad(jnp.concatenate(cols, axis=1), ((0, 0), (0, npad - nout)))
    b = jnp.pad(jnp.concatenate(bs, axis=0), (0, npad - nout)).reshape(1, npad)
    return {"regime": "concatenate", "w": w.astype(jnp.float32),
            "b": b.astype(jnp.float32), "nout": nout, "out_cols": npad}


def prepare_masternet_params(net_w, net_b, master_w, master_b, *, cpg):
    G, C, N = net_w.shape
    npad = _round_up(N, 128)
    # Master head: pad bias with a huge negative so argmax never picks padding.
    mw = jnp.pad(master_w, ((0, 0), (0, npad - N)))
    mb = jnp.pad(master_b, (0, npad - N), constant_values=-1e30)
    blocks_w = [mw] + [jnp.pad(net_w[g], ((0, 0), (0, npad - N)))
                       for g in range(G)]
    blocks_b = [mb] + [jnp.pad(net_b[g], (0, npad - N)) for g in range(G)]
    w = jnp.concatenate(blocks_w, axis=1)                   # (C, (1+G)*npad)
    b = jnp.concatenate(blocks_b, axis=0).reshape(1, (1 + G) * npad)
    return {"regime": "masternet", "w": w.astype(jnp.float32),
            "b": b.astype(jnp.float32), "npad": npad, "G": G, "N": N,
            "cpg": cpg, "out_cols": npad}


def _make_masternet_finalize(npad, G, cpg):
    def finalize(y):
        # y: (tile_b, (1+G)*npad); cols [0, npad) are the master logits.
        ym = y[:, :npad]
        m = jnp.max(ym, axis=1, keepdims=True)                        # (tb, 1)
        col = jax.lax.broadcasted_iota(jnp.int32, ym.shape, 1)
        idx = jnp.min(jnp.where(ym == m, col, npad), axis=1,
                      keepdims=True)                                  # argmax
        net_idx = jnp.minimum(idx // cpg, G - 1)                      # (tb, 1)
        out = y[:, npad:2 * npad]                                     # g == 0
        for g in range(1, G):
            out = jnp.where(net_idx == g,
                            y[:, (1 + g) * npad:(2 + g) * npad], out)
        return out
    return finalize


# ----------------------------------------------------------------------------
# Forward
# ----------------------------------------------------------------------------
def dycs_forward(x, prepared):
    """JAX/Pallas equivalent of DycsNet.forward on prepared parameters."""
    # TODO(synk): arbitrary per-sub-net backbones aren't expressible here; each
    # sub-net / master net is modeled as GAP(x) -> linear classifier head.
    B, C, H, W = x.shape
    x3 = x.reshape(B, C, H * W)                 # native dtype, no astype
    if prepared["regime"] == "concatenate":
        out = _fused_gap_linear(x3, prepared["w"], prepared["b"],
                                prepared["out_cols"], finalize=None)
        return out[:, :prepared["nout"]]
    elif prepared["regime"] == "masternet":
        fin = _make_masternet_finalize(prepared["npad"], prepared["G"],
                                       prepared["cpg"])
        out = _fused_gap_linear(x3, prepared["w"], prepared["b"],
                                prepared["out_cols"], finalize=fin)
        return out[:, :prepared["N"]]
    else:
        raise Exception("unknown dycs_regime")


# ----------------------------------------------------------------------------
# Pure-JAX reference (mirrors the PyTorch forward semantics)
# ----------------------------------------------------------------------------
def dycs_reference(x, net_w, net_b, master_w, master_b, *,
                   regime, meaning_neurons, cpg):
    B, C, H, W = x.shape
    feats = x.reshape(B, C, H * W).astype(jnp.float32).mean(-1)
    ys = jnp.einsum("bc,gcn->gbn", feats, net_w) + net_b[:, None, :]
    G = net_w.shape[0]
    if regime == "concatenate":
        if meaning_neurons == "first":
            parts = [ys[i][:, :cpg] for i in range(G)]
        else:
            parts = [ys[i][:, i * cpg:(i + 1) * cpg] for i in range(G)]
        return jnp.concatenate(parts, axis=1)
    ym = feats @ master_w + master_b
    index = jnp.argmax(ym, axis=1)
    net_index = index // cpg
    return ys[net_index, jnp.arange(B)]


# ----------------------------------------------------------------------------
# Main
# ----------------------------------------------------------------------------
if __name__ == "__main__":
    B, C, H, W = 2, 4, 32, 32     # HW = 1024 -> 512-lane chunks -> 2-step GAP
    G = 2                         # number of sub-nets
    N = 16                        # logits per sub-net (stands in for 1000)
    CPG = 8                       # dycs_classes_per_group (G * CPG == N here)

    key = jax.random.PRNGKey(0)
    kx, kw, kb, kmw, kmb = jax.random.split(key, 5)
    x = jax.random.normal(kx, (B, C, H, W), dtype=jnp.float32)
    net_w = jax.random.normal(kw, (G, C, N), dtype=jnp.float32) * 0.1
    net_b = jax.random.normal(kb, (G, N), dtype=jnp.float32) * 0.1
    master_w = jax.random.normal(kmw, (C, N), dtype=jnp.float32) * 0.1
    master_b = jax.random.normal(kmb, (N,), dtype=jnp.float32) * 0.1

    ok = True
    for regime, meaning in [("concatenate", "first"),
                            ("concatenate", "inplace"),
                            ("masternet", "inplace")]:
        if regime == "concatenate":
            prep = prepare_concat_params(net_w, net_b, cpg=CPG,
                                         meaning_neurons=meaning)
        else:
            prep = prepare_masternet_params(net_w, net_b, master_w, master_b,
                                            cpg=CPG)
        out = jax.block_until_ready(dycs_forward(x, prep))
        ref = dycs_reference(x, net_w, net_b, master_w, master_b,
                             regime=regime, meaning_neurons=meaning, cpg=CPG)
        if not jnp.allclose(out, ref, atol=1e-4, rtol=1e-4):
            ok = False
            print(f"MISMATCH in regime={regime} meaning={meaning}")

    if ok:
        print("KERNEL_OK")
</pallas_src>

<mosaic_0001>
module attributes {stable_mosaic.version = 11 : i64} {
  func.func @kernel(%arg0: i32, %arg1: i32, %arg2: memref<2x4x512xf32, #tpu.memory_space<vmem>>, %arg3: memref<4x128xf32, #tpu.memory_space<vmem>>, %arg4: memref<1x128xf32, #tpu.memory_space<vmem>>, %arg5: memref<2x128xf32, #tpu.memory_space<vmem>>, %arg6: memref<2x4xf32, #tpu.memory_space<vmem>>) attributes {dimension_semantics = [#tpu.dimension_semantics<parallel>, #tpu.dimension_semantics<arbitrary>], iteration_bounds = array<i64: 1, 2>, scalar_prefetch = 0 : i64, scratch_operands = 1 : i64, tpu.core_type = #tpu.core_type<tc>, window_params = [{transform_indices = @transform_0, window_bounds = array<i64: 2, 4, 512>}, {pipeline_mode = #tpu.pipeline_mode<synchronous>, transform_indices = @transform_1, window_bounds = array<i64: 4, 128>}, {pipeline_mode = #tpu.pipeline_mode<synchronous>, transform_indices = @transform_2, window_bounds = array<i64: 1, 128>}, {transform_indices = @transform_3, window_bounds = array<i64: 2, 128>}]} {
    %c0_i32 = arith.constant 0 : i32
    %0 = arith.cmpi eq, %arg1, %c0_i32 : i32
    %1 = arith.extui %0 : i1 to i32
    %c0_i32_0 = arith.constant 0 : i32
    %2 = arith.cmpi ne, %1, %c0_i32_0 : i32
    scf.if %2 {
      %cst_8 = arith.constant 0.000000e+00 : f32
      %11 = vector.broadcast %cst_8 : f32 to vector<2x4xf32>
      %c0_9 = arith.constant 0 : index
      %c0_10 = arith.constant 0 : index
      %12 = vector.load %arg6[%c0_9, %c0_10] : memref<2x4xf32, #tpu.memory_space<vmem>>, vector<2x4xf32>
      tpu.vector_store %arg6[%c0_9, %c0_10], %11 {strides = array<i32>} : memref<2x4xf32, #tpu.memory_space<vmem>>, vector<2x4xf32>,
    } else {
    }
    %c0 = arith.constant 0 : index
    %c0_1 = arith.constant 0 : index
    %3 = vector.load %arg6[%c0, %c0_1] : memref<2x4xf32, #tpu.memory_space<vmem>>, vector<2x4xf32>
    %c0_2 = arith.constant 0 : index
    %c0_3 = arith.constant 0 : index
    %c0_4 = arith.constant 0 : index
    %4 = vector.load %arg2[%c0_2, %c0_3, %c0_4] : memref<2x4x512xf32, #tpu.memory_space<vmem>>, vector<2x4x512xf32>
    %cst = arith.constant dense<0.000000e+00> : vector<2x4xf32>
    %5 = vector.multi_reduction <add>, %4, %cst [2] : vector<2x4x512xf32> to vector<2x4xf32>
    %6 = arith.addf %3, %5 : vector<2x4xf32>
    %c0_5 = arith.constant 0 : index
    %c0_6 = arith.constant 0 : index
    %7 = vector.load %arg6[%c0_5, %c0_6] : memref<2x4xf32, #tpu.memory_space<vmem>>, vector<2x4xf32>
    tpu.vector_store %arg6[%c0_5, %c0_6], %6 {strides = array<i32>} : memref<2x4xf32, #tpu.memory_space<vmem>>, vector<2x4xf32>,
    %c1_i32 = arith.constant 1 : i32
    %8 = arith.cmpi eq, %arg1, %c1_i32 : i32
    %9 = arith.extui %8 : i1 to i32
    %c0_i32_7 = arith.constant 0 : i32
    %10 = arith.cmpi ne, %9, %c0_i32_7 : i32
    scf.if %10 {
      %c0_8 = arith.constant 0 : index
      %c0_9 = arith.constant 0 : index
      %11 = vector.load %arg6[%c0_8, %c0_9] : memref<2x4xf32, #tpu.memory_space<vmem>>, vector<2x4xf32>
      %cst_10 = arith.constant 9.765625E-4 : f32
      %12 = vector.broadcast %cst_10 : f32 to vector<2x4xf32>
      %13 = arith.mulf %11, %12 : vector<2x4xf32>
      %c0_11 = arith.constant 0 : index
      %c0_12 = arith.constant 0 : index
      %14 = vector.load %arg3[%c0_11, %c0_12] : memref<4x128xf32, #tpu.memory_space<vmem>>, vector<4x128xf32>
      %cst_13 = arith.constant dense<0.000000e+00> : vector<2x128xf32>
      %15 = tpu.matmul %13, %14, %cst_13 {dimension_numbers = #tpu.dot_dimension_numbers<[1], [0], [0], [1], [0, 0, 1, 1], [], []>} : vector<2x4xf32>, vector<4x128xf32>, vector<2x128xf32> -> vector<2x128xf32>
      %c0_14 = arith.constant 0 : index
      %c0_15 = arith.constant 0 : index
      %16 = vector.load %arg4[%c0_14, %c0_15] : memref<1x128xf32, #tpu.memory_space<vmem>>, vector<1x128xf32>
      %17 = vector.broadcast %16 : vector<1x128xf32> to vector<2x128xf32>
      %18 = arith.addf %15, %17 : vector<2x128xf32>
      %c0_16 = arith.constant 0 : index
      %c0_17 = arith.constant 0 : index
      %19 = vector.load %arg5[%c0_16, %c0_17] : memref<2x128xf32, #tpu.memory_space<vmem>>, vector<2x128xf32>
      tpu.vector_store %arg5[%c0_16, %c0_17], %18 {strides = array<i32>} : memref<2x128xf32, #tpu.memory_space<vmem>>, vector<2x128xf32>,
    } else {
    }
    return
  }
  func.func @transform_0(%arg0: i32, %arg1: i32) -> (i32, i32, i32) {
    %c0_i32 = arith.constant 0 : i32
    %c0_i32_0 = arith.constant 0 : i32
    return %arg0, %c0_i32, %arg1 : i32, i32, i32
  }
  func.func @transform_1(%arg0: i32, %arg1: i32) -> (i32, i32) {
    %c0_i32 = arith.constant 0 : i32
    %c0_i32_0 = arith.constant 0 : i32
    %c0_i32_1 = arith.constant 0 : i32
    return %c0_i32, %c0_i32_0 : i32, i32
  }
  func.func @transform_2(%arg0: i32, %arg1: i32) -> (i32, i32) {
    %c0_i32 = arith.constant 0 : i32
    %c0_i32_0 = arith.constant 0 : i32
    %c0_i32_1 = arith.constant 0 : i32
    return %c0_i32, %c0_i32_0 : i32, i32
  }
  func.func @transform_3(%arg0: i32, %arg1: i32) -> (i32, i32) {
    %c0_i32 = arith.constant 0 : i32
    %c0_i32_0 = arith.constant 0 : i32
    return %arg0, %c0_i32 : i32, i32
  }
}

</mosaic_0001>

<bundles_post_ra>
// kernel: tpu_custom_call.1
= control target key start
LH: loop header
LB: loop body
LE: loop exit
PB: predicated region body
PF: predicated region fallthrough
CT: control target
= control target key end

     0   :  { %8 = vsyncpa [#allocation4], 0  ;;  %s935_s0 = inlined_call_operand.hbm [shape: f32[2,4,1024], index: 0, kind: input, shape index: {}]   ;;  %s936_s1 = inlined_call_operand.hbm [shape: f32[4,128], index: 1, kind: input, shape index: {}]   ;;  %s937_s2 = inlined_call_operand.vmem [shape: f32[1,128], index: 2, kind: input, shape index: {}]   ;;  %s938_s3 = inlined_call_operand.hbm [shape: f32[2,128], index: 3, kind: output, shape index: {}]  }
   0x1   :  { %10 = vsyncpa [#allocation4 + $0x1], 0 }
   0x2   :  { %11 = vsyncpa [#allocation7], 0 }
   0x3   :  { %12 = vsyncpa [#allocation5], 0  ;;  %s732_s12 = smov 0   ;;  %s734_s13 = smov 0  }
   0x4   :  { %s736_s14 = smov 0   ;;  %s738_s15 = smov 0  }
   0x5   :  { %s740_s16 = smov 0   ;;  %s742_s17 = smov 0  }
   0x6 LB: > { %s449_s18 = sadd.s32 4294967295, %s701_s17   ;;  %s39_s19 = sadd.s32 1, %s689_s14  ;;  %s701_s17 = sphi %s742_s17, %s18_s17   ;;  %s697_s16 = sphi %s740_s16, %s958_s16   ;;  %s693_s15 = sphi %s738_s15, %s957_s15   ;;  %s689_s14 = sphi %s736_s14, %s956_s14   ;;  %s685_s13 = sphi %s734_s13, %s955_s13   ;;  %s681_s12 = sphi %s732_s12, %s954_s12  }
   0x7   : > { %p46_p0 = scmp.ne.s32.totalorder %s689_s14, %s685_s13  ;;  %p47_p1 = scmp.eq.s32.totalorder %s701_s17, 0 }
   0x8   : > { %p52_p2 = scmp.ne.s32.totalorder %s685_s13, %s681_s12  ;;  %p768_p3 = scmp.eq.s32.totalorder %s449_s18, 0 }
   0x9   : > { %p48_p4 = por %p47_p1, %p46_p0  ;;  %p450_p5 = scmp.ge.s32.totalorder %s701_s17, 1 }
   0xa   : > { %s944_s20 = scalar_select %p768_p3, 1, 0 }
   0xb   : > { %p775_p6 = por %p768_p3, %p52_p2  ;;  %p131_p7 = scmp.lt.s32.totalorder %s701_s17, 3 }
   0xc   : > { %s703_s23 = smov [#allocation6]   ;;  %p495_p10 = scmp.lt.s32.totalorder %s701_s17, 2 }
   0xd   : > { %s945_s21 = scalar_select %p775_p6, 1, 0 }
   0xe   : > { %p780_p8 = pnand %p450_p5, %p131_p7  ;;  %s144_s24 = sshll.u32 %s703_s23, 4  ;;  %s145_s24 = int_to_ptr.vmem [resolvable:$true] %s144_s24 }
   0xf   : > { %s158_s25 = sand.u32 1, %s689_s14   ;;  %p794_p12 = pnand %p495_p10, %p48_p4 }
  0x10   : > { %s946_s22 = scalar_select %p780_p8, 1, 0 }
  0x11   : > { %p486_p9 = pneg %p780_p8  ;;  %s559_s30 = scalar_lea.hbm %s936_s1, 64 }
  0x12   : > { %s948_s27 = scalar_select %p794_p12, 1, 0 }
  0x13   : > { %p790_p11 = pnand %p486_p9, %p768_p3  ;;  %p560_p13 = scmp.ne.s32.totalorder %s936_s1, %s559_s30 }
  0x14   : > { %p566_p5 = scmp.lt.u32.totalorder %s559_s30, %s936_s1 }
  0x15   : > { %p561_p0 = pneg %p790_p11 }
  0x17   : > { %p562_p1 = pnand %p561_p0, %p560_p13 }
  0x19   : > { %p563_p2 = pneg %p562_p1 }
  0x1b   : > { %p568_p4 = pnand %p566_p5, %p563_p2 }
  0x1d   : > { %571 = shalt.err (!%p568_p4)
}
  0x1e   : > { %s572_s8 = scalar_lea.vmem %s145_s24, 64  ;;  %p580_p3 = scmp.lt.s32.totalorder %s145_s24, %s145_s24 }
  0x1f   : > { %p573_p7 = scmp.ne.s32.totalorder %s145_s24, %s572_s8  ;;  %p581_p6 = scmp.lt.s32.totalorder %s572_s8, %s572_s8 }
  0x21   : > { %p575_p9 = pnand %p573_p7, %p561_p0  ;;  %p582_p8 = por %p581_p6, %p580_p3 }
  0x23   : > { %p576_p10 = pneg %p575_p9 }
  0x25   : > { %p583_p12 = pnand %p582_p8, %p576_p10 }
  0x27   : > { %586 = shalt.err (!%p583_p12)
}
  0x28   : > { %489 = dma.hbm_to_vmem [thread:$0]  (!%p790_p11), %s936_s1, 64, %s145_s24, [#allocation7]  }
  0x29   : > { %s27_s11 = sadd.s32 1, %s697_s16  ;;  %s453_s12 = sshll.u32 %s158_s25, 5 }
  0x2a   : > { %p28_p3 = scmp.ge.s32.totalorder %s27_s11, 2  ;;  %s468_s23 = sshll.u32 %s697_s16, 8 }
  0x2b   : > { %s162_s28 = scalar_lea.vmem [#allocation3], %s453_s12  ;;  %s823_s4 = scalar_lea.hbm %s935_s0, %s468_s23 }
  0x2c   : > { %s172_s26 = sshll.u32 %s162_s28, 4  ;;  %s960_s11 = smov (%p28_p3, %s27_s11), 0  ;;  %s825_s26 = int_to_ptr.vmem [resolvable:$true] %s172_s26 }
  0x2d   : > { %s35_s24 = ssub.s32 %s697_s16, %s960_s11  ;;  %s836_s6 = scalar_lea.sflag [#allocation4], %s158_s25 }
  0x2e   : > { %p37_p6 = scmp.eq.s32.totalorder %s35_s24, 0  ;;  %s587_s7 = scalar_lea.hbm %s823_s4, 512 }
  0x2f   : > { %p588_p8 = scmp.ne.s32.totalorder %s823_s4, %s587_s7  ;;  %p949_p11 = scmp.ne.s32.totalorder %s948_s27, 0 }
  0x30   : > { %s832_s5 = scalar_select %p37_p6, %s689_s14, %s39_s19  }
  0x31   : > { %p589_p12 = pneg %p949_p11  ;;  %s592_s10 = scalar_lea.hbm %s935_s0, 1024 }
  0x32   : > { %p593_p1 = scmp.lt.u32.totalorder %s823_s4, %s935_s0  ;;  %p594_p2 = scmp.lt.u32.totalorder %s592_s10, %s587_s7 }
  0x33   : > { %p590_p13 = pnand %p589_p12, %p588_p8  ;;  %p596_p4 = scmp.lt.u32.totalorder %s587_s7, %s823_s4 }
  0x34   : > { %p595_p5 = por %p594_p2, %p593_p1 }
  0x35   : > { %p591_p0 = pneg %p590_p13 }
  0x36   : > { %p597_p7 = por %p596_p4, %p595_p5 }
  0x38   : > { %p598_p9 = pnand %p597_p7, %p591_p0 }
  0x3a   : > { %601 = shalt.err (!%p598_p9)
}
  0x3b   : > { %s602_s19 = scalar_lea.vmem %s825_s26, 512  ;;  %s704_s25 = smov [#allocation3]  }
  0x3c   : > { %p603_p10 = scmp.ne.s32.totalorder %s825_s26, %s602_s19  ;;  %s607_s28 = sshll.u32 %s704_s25, 4  ;;  %s608_s28 = int_to_ptr.vmem [resolvable:$false] %s607_s28 }
  0x3d   : > { %s609_s29 = scalar_lea.vmem %s608_s28, 1024  ;;  %p610_p8 = scmp.lt.s32.totalorder %s825_s26, %s608_s28 }
  0x3e   : > { %p605_p3 = pnand %p603_p10, %p589_p12  ;;  %p611_p13 = scmp.lt.s32.totalorder %s609_s29, %s602_s19 }
  0x40   : > { %p606_p6 = pneg %p605_p3  ;;  %p612_p1 = por %p611_p13, %p610_p8 }
  0x42   : > { %p613_p2 = pnand %p612_p1, %p606_p6 }
  0x44   : > { %616 = shalt.err (!%p613_p2)
}
  0x45   : > { %s705_s30 = smov 512   ;;  %s706_s24 = smov 256  }
  0x46   : > { %s707_s7 = smov 16   ;;  %p950_p12 = scmp.ne.s32.totalorder %s946_s22, 0 }
  0x47   : > { %493 = dma.hbm_to_vmem [thread:$0]  (!%p949_p11), %s823_s4, 512, %s825_s26, %s836_s6, %s705_s30, %s706_s24, %s707_s7  }
  0x48   : > { %184 = sbr.rel (%p950_p12) target bundleno = 503 (0x1f7), region = 32  ;;  %s186_s8 = sand.u32 (!%p950_p12), 1, %s685_s13  }
  0x49   : > { %s457_s9 = sshll.u32 (!%p950_p12), %s186_s8, 5  ;;  %s187_s10 = scalar_lea.sflag (!%p950_p12), [#allocation4], %s186_s8 }
  0x4a   : > { %s190_s12 = scalar_lea.vmem (!%p950_p12), [#allocation3], %s457_s9  ;;  %p951_p0 = scmp.ne.s32.totalorder (!%p950_p12), %s945_s21, 0 }
  0x4f   : > { %668 = dma.done.wait (%p951_p0), %s187_s10, 512  }
  0x50   : > { %670 = vsyncadd (%p951_p0), %s187_s10, 4294966784  ;;  %p952_p5 = scmp.ne.s32.totalorder %s944_s20, 0 }
  0x52   : > { %672 = dma.done.wait (%p952_p5), [#allocation7], 64  }
  0x53   : > { %674 = vsyncadd (%p952_p5), [#allocation7], 4294967232  ;;  %p459_p11 = scmp.ne.s32.totalorder %s693_s15, 0 }
  0x54   : > { %vm218_vm0 = vcmask (!%p459_p11), 25600   ;;  %v708_v0 = vmov (!%p459_p11), 0.0  }
  0x55   : > { %217 = sbr.rel (%p459_p11) target bundleno = 92 (0x5c), region = 44  ;;  %219 = vst.msk [vmem:[#allocation2] sm:$0x3] (!%p459_p11), %vm218_vm0, %v708_v0 }
  0x5c PF: > { %v221_v1 = vld [vmem:[%s190_s12] sm:$0xff]  ;;  %v222_v2 = vld [vmem:[%s190_s12 + $0x8] sm:$0xff]  ;;  %vm237_vm1 = vcmask 1043456   ;;  %v223_v3 = vld [vmem:[%s190_s12 + $0x10] sm:$0xff]  ;;  %v258_v23 = vlaneseq  ;;  %vm268_vm2 = vcmask 1041409   ;;  %vm272_vm3 = vcmask 25600  }
  0x5d   : > { %v229_v4 = vcombine.high %v221_v1, %v221_v1  ;;  %v230_v5 = vcombine.high %v222_v2, %v222_v2  ;;  %v238_v6 = vsel %vm237_vm1, %v221_v1, 0.0  ;;  %v224_v7 = vld [vmem:[%s190_s12 + $0x18] sm:$0xff]  ;;  %v231_v8 = vcombine.high %v223_v3, %v223_v3  ;;  %p460_p4 = scmp.ne.s32.totalorder %s693_s15, 1 }
  0x5e   : > { %v247_v9 = vsel %vm237_vm1, %v223_v3, 0.0  ;;  %v241_v11 = vsel %vm237_vm1, %v222_v2, 0.0  ;;  %v232_v12 = vcombine.high %v224_v7, %v224_v7  ;;  %v250_v15 = vsel %vm237_vm1, %v224_v7, 0.0  ;;  %v220_v30 = vld [vmem:[#allocation2] sm:$0x3] }
  0x5f   : > { %v239_v10 = vsel %vm237_vm1, %v229_v4, 0.0  ;;  %v248_v14 = vsel %vm237_vm1, %v231_v8, 0.0  ;;  %v243_v16 = vsel %vm237_vm1, %v230_v5, 0.0  ;;  %v259_v24 = vand.u32 127, %v258_v23  ;;  %v280_v34 = vld [vmem:[#allocation6] sm:$0xf] (!%p460_p4) }
  0x60   : > { %v240_v13 = vadd.f32 %v239_v10, %v238_v6  ;;  %v249_v17 = vadd.f32 %v248_v14, %v247_v9  ;;  %v252_v20 = vsel %vm237_vm1, %v232_v12, 0.0  ;;  %v261_v25 = vshrl.u32 %v258_v23, 7  ;;  %v461_v38 = vld [vmem:[%s937_s2] ss:$0 sm:$0xff] (!%p460_p4) }
  0x61   : > { %v709_v36 = vmov (!%p460_p4), 0.0   ;;  %vm710_vm4 = vmmov (!%p460_p4), 0   ;;  %vm288_vm5 = vcmask (!%p460_p4), 31744  }
  0x62   : > { %v242_v18 = vadd.f32 %v241_v11, %v240_v13  ;;  %v251_v19 = vadd.f32 %v250_v15, %v249_v17  ;;  %v262_v27 = vsub.s32 %v259_v24, %v261_v25  ;;  %471 = vmatprep.subr.mxu0 (!%p460_p4), %v709_v36  ;;  %473 = vmatprep.mubr.msk.f32.mxu0 (!%p460_p4), %vm710_vm4, %v709_v36 }
  0x63   : > { %472 = vmatpush3.msk.msra.mxu0 (!%p460_p4), %vm237_vm1, %v280_v34 }
  0x64   : > { %v244_v21 = vadd.f32 %v243_v16, %v242_v18  ;;  %v253_v22 = vadd.f32 %v252_v20, %v251_v19 }
  0x66   : > { %245 = vadd.xlane.f32.xlu0 %v244_v21 }
  0x6a   : > { %254 = vadd.xlane.f32.xlu0 %v253_v22 }
  0xf3   : > { %v246_v26 = vpop.xlane.xlu0 %245 }
  0xf4   : > { %v263_v29 = vrot.slane %v246_v26, %v262_v27 }
  0xf7   : > { %v255_v28 = vpop.xlane.xlu0 %254  ;;  %277 = sbr.rel (%p460_p4) target bundleno = 478 (0x1de), region = 48 }
  0xf8   : > { %v267_v31 = vrot.slane %v255_v28, %v262_v27 }
  0xfa   : > { %v269_v32 = vsel %vm268_vm2, %v267_v31, %v263_v29 }
  0xfb   : > { %v271_v33 = vadd.f32 %v269_v32, %v220_v30 }
  0xfd   : > { %273 = vst.msk [vmem:[#allocation2] sm:$0x3] %vm272_vm3, %v271_v33 }
 0x104   : > { %v278_v35 = vld [vmem:[#allocation2] sm:$0x3] }
 0x105   : > { %v279_v37 = vmul.f32 0.0009765625, %v278_v35 }
 0x107   : > { %474 = vmatmul.mubr.msk.f32.vlgmr.msra.gmra.mrb[0].mxu0 %vm288_vm5, %v279_v37 }
 0x1da   : > { %v361_v39 = vpop.f32.mrb[0].mxu0 }
 0x1db   : > { %v362_v40 = vadd.f32 %v461_v38, %v361_v39  ;;  %v475_v41 = vpop.f32.mrb[1].mxu0 }
 0x1dd   : > { %365 = vst [vmem:[#allocation8] sm:$0x3] %v362_v40 }
 0x1de PF: > { %p891_p7 = scmp.eq.s32.totalorder %s449_s18, 1  ;;  %s711_s22 = smov [#allocation8]  }
 0x1df   : > { %s375_s27 = sshll.u32 %s711_s22, 4  ;;  %s376_s27 = int_to_ptr.vmem [resolvable:$true] %s375_s27 }
 0x1e0   : > { %s617_s26 = scalar_lea.vmem %s376_s27, 32  ;;  %p624_p6 = scmp.lt.s32.totalorder %s376_s27, %s376_s27 }
 0x1e1   : > { %p618_p9 = scmp.ne.s32.totalorder %s376_s27, %s617_s26  ;;  %p625_p8 = scmp.lt.s32.totalorder %s617_s26, %s617_s26 }
 0x1e3   : > { %p619_p10 = pnand %p618_p9, %p891_p7  ;;  %p626_p13 = por %p625_p8, %p624_p6 }
 0x1e5   : > { %p620_p3 = pneg %p619_p10 }
 0x1e7   : > { %p627_p1 = pnand %p626_p13, %p620_p3 }
 0x1e9   : > { %630 = shalt.err (!%p627_p1)
}
 0x1ea   : > { %s631_s18 = scalar_lea.hbm %s938_s3, 32 }
 0x1eb   : > { %p632_p2 = scmp.ne.s32.totalorder %s938_s3, %s631_s18  ;;  %p637_p5 = scmp.lt.u32.totalorder %s631_s18, %s938_s3 }
 0x1ed   : > { %p633_p12 = pnand %p632_p2, %p891_p7 }
 0x1ef   : > { %p634_p0 = pneg %p633_p12 }
 0x1f1   : > { %p639_p11 = pnand %p637_p5, %p634_p0 }
 0x1f3   : > { %642 = shalt.err (!%p639_p11)
}
 0x1f4   : > { %483 = dma.vmem_to_hbm [thread:$0]  (%p891_p7), %s376_s27, 32, %s938_s3, [#allocation5]  }
 0x1f5   : > { %676 = dma.done.wait (%p891_p7), [#allocation5], 32  }
 0x1f6   : > { %678 = vsyncadd (%p891_p7), [#allocation5], 4294967264 }
 0x1f7 PF: > { %s18_s17 = sadd.s32 1, %s701_s17   ;;  %s954_s12 = smov %s685_s13 }
 0x1f8   : > { %p15_p4 = scmp.ge.s32.totalorder %s18_s17, 4   ;;  %s955_s13 = smov %s689_s14 }
 0x1f9   : > { %s956_s14 = smov %s832_s5  ;;  %s957_s15 = smov %s697_s16 }
 0x1fa   : > { %s958_s16 = smov %s960_s11  ;;  %17 = sbr.rel (!%p15_p4) target bundleno = 6 (0x6), region = 82 }
 0x201   :  { %388 = vsyncpa [#allocation4], 1 }
 0x202   :  { %390 = vsyncpa [#allocation4 + $0x1], 1 }
 0x203   :  { %391 = vsyncpa [#allocation7], 1 }
 0x204   :  { %392 = vsyncpa [#allocation5], 1 }
 0x205   :  { %394 = vsyncpa [#allocation5 + $0x1], 1 }

</bundles_post_ra>
